<compile_context>
chip_gen: v7x
topology: tpu7x:2x2x1
jax: 0.10.0
libtpu: 0.0.40
codegen_flags: <defaults>
</compile_context>

<pallas_src>
import jax
import jax.numpy as jnp
from jax.experimental import pallas as pl
from jax.experimental.pallas import tpu as pltpu


def upsample(x_nchw, weight_oihw):
    """Upsample forward: 3x3 conv (bias=False) + PixelShuffle(2).

    x_nchw      : (B, n_feat, H, W)
    weight_oihw : (2*n_feat, n_feat, 3, 3)   PyTorch Conv2d weight layout
    returns     : (B, n_feat // 2, 2*H, 2*W)
    """
    B, Cin, H, W = x_nchw.shape
    Cout = weight_oihw.shape[0]                       # 2 * n_feat
    assert Cout % 4 == 0, "PixelShuffle(2) needs conv output channels divisible by 4"
    C = Cout // 4                                     # channels after shuffle
    half = 2 * C                                      # columns per dh plane (dw, c)

    # --- H-strip size: several grid steps per image so the pipeline can overlap ----------
    T = H
    for cand in (32, 16, 8):
        if H % cand == 0 and H // cand >= 2:
            T = cand
            break
    S = H // T                                        # strips per image

    # --- boundary layout glue (kept only because the module interface is NCHW) -----------
    x_nhwc = jnp.transpose(x_nchw, (0, 2, 3, 1))      # (B, H, W, Cin)

    # Weight: OIHW with O = c*4 + dh*2 + dw  ->  rows (ky, kx, ci), cols (dh, dw, c).
    # Column permutation = PixelShuffle fused into the matmul, done once on the weight.
    w6 = weight_oihw.reshape(C, 2, 2, Cin, 3, 3)                  # (c, dh, dw, ci, ky, kx)
    w_mat = jnp.transpose(w6, (4, 5, 3, 1, 2, 0)).reshape(9 * Cin, Cout)
    w_mat = w_mat.astype(jnp.bfloat16)                            # bf16 MXU operand

    cdt = jnp.bfloat16                                            # matmul operand dtype

    def kernel(x_ref, w_ref, o_ref):
        # x_ref: (1, H, W, Cin)   full image, resident across strips of the same batch
        # w_ref: (9*Cin, Cout)    fused-tap weight, columns ordered (dh, dw, c)
        # o_ref: (1, 2, T, W, 2*C) two dh row-planes of the shuffled output strip
        s = pl.program_id(1)
        h0 = pl.multiple_of(s * T, T)

        # Strip rows + 1-row halo from the resident input; zero rows at the image edges.
        body = x_ref[0, pl.ds(h0, T), :, :]                               # (T, W, Cin)
        up = x_ref[0, pl.ds(jnp.maximum(h0 - 1, 0), 1), :, :]             # (1, W, Cin)
        dn = x_ref[0, pl.ds(jnp.minimum(h0 + T, H - 1), 1), :, :]         # (1, W, Cin)
        up = jnp.where(s > 0, up, jnp.zeros_like(up))
        dn = jnp.where(s < S - 1, dn, jnp.zeros_like(dn))
        xs = jnp.concatenate([up, body, dn], axis=0).astype(cdt)          # (T+2, W, Cin)

        # Three kx-shifted views built once (hoisted out of the 9-tap loop).
        zcol = jnp.zeros((T + 2, 1, Cin), cdt)
        x_km = jnp.concatenate([zcol, xs[:, :W - 1, :]], axis=1)          # w-1 (kx=0)
        x_kc = xs                                                         # w   (kx=1)
        x_kp = jnp.concatenate([xs[:, 1:, :], zcol], axis=1)              # w+1 (kx=2)

        # Flatten once (tile-preserving leading-dim merge); 9 taps are static row slices.
        flat = [v.reshape((T + 2) * W, Cin) for v in (x_km, x_kc, x_kp)]
        cols = []
        for ky in range(3):
            for kx in range(3):
                cols.append(flat[kx][ky * W:(ky + T) * W])                # (T*W, Cin)
        patch = jnp.concatenate(cols, axis=1)                             # (T*W, 9*Cin) bf16

        # Single fat-K MXU contraction, f32 accumulation.
        acc = jnp.dot(patch, w_ref[...], preferred_element_type=jnp.float32)  # (T*W, Cout)

        # Fused PixelShuffle output: per-dh plane, columns already in (dw, c) order.
        for dh in range(2):
            plane = acc[:, dh * half:(dh + 1) * half]                     # (T*W, 2*C)
            o_ref[0, dh, :, :, :] = plane.reshape(T, W, half).astype(o_ref.dtype)

    flops = 2 * B * H * W * (9 * Cin) * Cout
    bytes_accessed = (x_nhwc.size * x_nhwc.dtype.itemsize
                      + w_mat.size * w_mat.dtype.itemsize
                      + B * 2 * H * W * half * x_nchw.dtype.itemsize)

    out_flat = pl.pallas_call(
        kernel,
        out_shape=jax.ShapeDtypeStruct((B, 2, H, W, half), x_nchw.dtype),
        grid_spec=pltpu.PrefetchScalarGridSpec(
            num_scalar_prefetch=0,
            grid=(B, S),
            in_specs=[
                pl.BlockSpec((1, H, W, Cin), lambda b, s: (b, 0, 0, 0)),
                pl.BlockSpec((9 * Cin, Cout), lambda b, s: (0, 0)),
            ],
            out_specs=pl.BlockSpec((1, 2, T, W, half), lambda b, s: (b, 0, s, 0, 0)),
        ),
        compiler_params=pltpu.CompilerParams(
            dimension_semantics=("parallel", "parallel"),
            vmem_limit_bytes=48 * 1024 * 1024,
        ),
        cost_estimate=pl.CostEstimate(
            flops=flops, transcendentals=0, bytes_accessed=bytes_accessed),
    )(x_nhwc, w_mat)

    # out_flat[b, dh, h, w, dw*C + c] == conv[b, c*4 + dh*2 + dw, h, w]
    # Single boundary transpose back to the module's NCHW interface (rows 2h+dh, cols 2w+dw).
    y = out_flat.reshape(B, 2, H, W, 2, C)
    out = jnp.transpose(y, (0, 5, 2, 1, 3, 4)).reshape(B, C, 2 * H, 2 * W)
    return out


if __name__ == "__main__":
    # Small shapes consistent with the module: B=2, n_feat=8, H=W=16.
    B, n_feat, H, W = 2, 8, 16, 16
    key = jax.random.PRNGKey(0)
    k_x, k_w = jax.random.split(key)
    x = jax.random.normal(k_x, (B, n_feat, H, W), dtype=jnp.float32)
    weight = jax.random.normal(k_w, (2 * n_feat, n_feat, 3, 3), dtype=jnp.float32) * 0.1

    out = jax.block_until_ready(jax.jit(upsample)(x, weight))
    assert out.shape == (B, n_feat // 2, 2 * H, 2 * W)

    # Reference: XLA conv (NCHW/OIHW) + PyTorch-style PixelShuffle(2).
    conv_ref = jax.lax.conv_general_dilated(
        x, weight, window_strides=(1, 1), padding=((1, 1), (1, 1)),
        dimension_numbers=("NCHW", "OIHW", "NCHW"))
    r = 2
    C_out = (2 * n_feat) // (r * r)
    ref = conv_ref.reshape(B, C_out, r, r, H, W)
    ref = jnp.transpose(ref, (0, 1, 4, 2, 5, 3)).reshape(B, C_out, H * r, W * r)

    # bf16 MXU operands with f32 accumulation -> relaxed tolerance vs the f32 reference.
    err = float(jnp.max(jnp.abs(out - ref)))
    assert jnp.allclose(out, ref, atol=2e-2, rtol=2e-2), f"max abs err = {err}"

    print("KERNEL_OK")
</pallas_src>

<mosaic_0001>
module attributes {stable_mosaic.version = 11 : i64} {
  func.func @kernel(%arg0: i32, %arg1: i32, %arg2: memref<1x16x16x8xf32, #tpu.memory_space<vmem>>, %arg3: memref<72x16xbf16, #tpu.memory_space<vmem>>, %arg4: memref<1x2x8x16x8xf32, #tpu.memory_space<vmem>>) attributes {dimension_semantics = [#tpu.dimension_semantics<parallel>, #tpu.dimension_semantics<parallel>], iteration_bounds = array<i64: 2, 2>, scalar_prefetch = 0 : i64, scratch_operands = 0 : i64, tpu.core_type = #tpu.core_type<tc>, window_params = [{transform_indices = @transform_0, window_bounds = array<i64: 1, 16, 16, 8>}, {pipeline_mode = #tpu.pipeline_mode<synchronous>, transform_indices = @transform_1, window_bounds = array<i64: 72, 16>}, {transform_indices = @transform_2, window_bounds = array<i64: 1, 2, 8, 16, 8>}]} {
    %c8_i32 = arith.constant 8 : i32
    %0 = arith.muli %arg1, %c8_i32 : i32
    %1 = tpu.assume_multiple %0, 8 : i32
    %c0 = arith.constant 0 : index
    %2 = arith.index_cast %1 : i32 to index
    %c0_0 = arith.constant 0 : index
    %c0_1 = arith.constant 0 : index
    %3 = vector.load %arg2[%c0, %2, %c0_0, %c0_1] : memref<1x16x16x8xf32, #tpu.memory_space<vmem>>, vector<1x8x16x8xf32>
    %4 = vector.shape_cast %3 : vector<1x8x16x8xf32> to vector<8x16x8xf32>
    %c1_i32 = arith.constant 1 : i32
    %5 = arith.subi %1, %c1_i32 : i32
    %c0_i32 = arith.constant 0 : i32
    %6 = arith.maxsi %5, %c0_i32 : i32
    %c0_2 = arith.constant 0 : index
    %7 = arith.index_cast %6 : i32 to index
    %c0_3 = arith.constant 0 : index
    %c0_4 = arith.constant 0 : index
    %8 = vector.load %arg2[%c0_2, %7, %c0_3, %c0_4] : memref<1x16x16x8xf32, #tpu.memory_space<vmem>>, vector<1x1x16x8xf32>
    %9 = vector.shape_cast %8 : vector<1x1x16x8xf32> to vector<1x16x8xf32>
    %c8_i32_5 = arith.constant 8 : i32
    %10 = arith.addi %1, %c8_i32_5 : i32
    %c15_i32 = arith.constant 15 : i32
    %11 = arith.minsi %10, %c15_i32 : i32
    %c0_6 = arith.constant 0 : index
    %12 = arith.index_cast %11 : i32 to index
    %c0_7 = arith.constant 0 : index
    %c0_8 = arith.constant 0 : index
    %13 = vector.load %arg2[%c0_6, %12, %c0_7, %c0_8] : memref<1x16x16x8xf32, #tpu.memory_space<vmem>>, vector<1x1x16x8xf32>
    %14 = vector.shape_cast %13 : vector<1x1x16x8xf32> to vector<1x16x8xf32>
    %c0_i32_9 = arith.constant 0 : i32
    %15 = arith.cmpi sgt, %arg1, %c0_i32_9 : i32
    %cst = arith.constant 0.000000e+00 : f32
    %16 = vector.broadcast %cst : f32 to vector<1x16x8xf32>
    %17 = arith.select %15, %9, %16 : vector<1x16x8xf32>
    %c1_i32_10 = arith.constant 1 : i32
    %18 = arith.cmpi slt, %arg1, %c1_i32_10 : i32
    %cst_11 = arith.constant 0.000000e+00 : f32
    %19 = vector.broadcast %cst_11 : f32 to vector<1x16x8xf32>
    %20 = arith.select %18, %14, %19 : vector<1x16x8xf32>
    %21 = tpu.concatenate %17, %4, %20 in 0 : vector<1x16x8xf32>, vector<8x16x8xf32>, vector<1x16x8xf32> -> vector<10x16x8xf32>
    %22 = arith.truncf %21 : vector<10x16x8xf32> to vector<10x16x8xbf16>
    %cst_12 = arith.constant 0.000000e+00 : bf16
    %23 = vector.broadcast %cst_12 : bf16 to vector<10x1x8xbf16>
    %24 = vector.extract_strided_slice %22 {offsets = [0, 0, 0], sizes = [10, 15, 8], strides = [1, 1, 1]} : vector<10x16x8xbf16> to vector<10x15x8xbf16>
    %25 = tpu.concatenate %23, %24 in 1 : vector<10x1x8xbf16>, vector<10x15x8xbf16> -> vector<10x16x8xbf16>
    %26 = vector.extract_strided_slice %22 {offsets = [0, 1, 0], sizes = [10, 15, 8], strides = [1, 1, 1]} : vector<10x16x8xbf16> to vector<10x15x8xbf16>
    %27 = tpu.concatenate %26, %23 in 1 : vector<10x15x8xbf16>, vector<10x1x8xbf16> -> vector<10x16x8xbf16>
    %28 = vector.shape_cast %25 : vector<10x16x8xbf16> to vector<160x8xbf16>
    %29 = vector.shape_cast %22 : vector<10x16x8xbf16> to vector<160x8xbf16>
    %30 = vector.shape_cast %27 : vector<10x16x8xbf16> to vector<160x8xbf16>
    %31 = vector.extract_strided_slice %28 {offsets = [0, 0], sizes = [128, 8], strides = [1, 1]} : vector<160x8xbf16> to vector<128x8xbf16>
    %32 = vector.extract_strided_slice %29 {offsets = [0, 0], sizes = [128, 8], strides = [1, 1]} : vector<160x8xbf16> to vector<128x8xbf16>
    %33 = vector.extract_strided_slice %30 {offsets = [0, 0], sizes = [128, 8], strides = [1, 1]} : vector<160x8xbf16> to vector<128x8xbf16>
    %34 = vector.extract_strided_slice %28 {offsets = [16, 0], sizes = [128, 8], strides = [1, 1]} : vector<160x8xbf16> to vector<128x8xbf16>
    %35 = vector.extract_strided_slice %29 {offsets = [16, 0], sizes = [128, 8], strides = [1, 1]} : vector<160x8xbf16> to vector<128x8xbf16>
    %36 = vector.extract_strided_slice %30 {offsets = [16, 0], sizes = [128, 8], strides = [1, 1]} : vector<160x8xbf16> to vector<128x8xbf16>
    %37 = vector.extract_strided_slice %28 {offsets = [32, 0], sizes = [128, 8], strides = [1, 1]} : vector<160x8xbf16> to vector<128x8xbf16>
    %38 = vector.extract_strided_slice %29 {offsets = [32, 0], sizes = [128, 8], strides = [1, 1]} : vector<160x8xbf16> to vector<128x8xbf16>
    %39 = vector.extract_strided_slice %30 {offsets = [32, 0], sizes = [128, 8], strides = [1, 1]} : vector<160x8xbf16> to vector<128x8xbf16>
    %40 = tpu.concatenate %31, %32, %33, %34, %35, %36, %37, %38, %39 in 1 : vector<128x8xbf16>, vector<128x8xbf16>, vector<128x8xbf16>, vector<128x8xbf16>, vector<128x8xbf16>, vector<128x8xbf16>, vector<128x8xbf16>, vector<128x8xbf16>, vector<128x8xbf16> -> vector<128x72xbf16>
    %c0_13 = arith.constant 0 : index
    %c0_14 = arith.constant 0 : index
    %41 = vector.load %arg3[%c0_13, %c0_14] : memref<72x16xbf16, #tpu.memory_space<vmem>>, vector<72x16xbf16>
    %cst_15 = arith.constant dense<0.000000e+00> : vector<128x16xf32>
    %42 = tpu.matmul %40, %41, %cst_15 {dimension_numbers = #tpu.dot_dimension_numbers<[1], [0], [0], [1], [0, 0, 1, 1], [], []>} : vector<128x72xbf16>, vector<72x16xbf16>, vector<128x16xf32> -> vector<128x16xf32>
    %43 = vector.extract_strided_slice %42 {offsets = [0, 0], sizes = [128, 8], strides = [1, 1]} : vector<128x16xf32> to vector<128x8xf32>
    %44 = vector.shape_cast %43 : vector<128x8xf32> to vector<8x16x8xf32>
    %c0_16 = arith.constant 0 : index
    %c0_17 = arith.constant 0 : index
    %c0_18 = arith.constant 0 : index
    %c0_19 = arith.constant 0 : index
    %c0_20 = arith.constant 0 : index
    %45 = vector.load %arg4[%c0_16, %c0_17, %c0_18, %c0_19, %c0_20] : memref<1x2x8x16x8xf32, #tpu.memory_space<vmem>>, vector<1x1x8x16x8xf32>
    %46 = vector.shape_cast %45 : vector<1x1x8x16x8xf32> to vector<8x16x8xf32>
    %47 = vector.shape_cast %44 : vector<8x16x8xf32> to vector<1x1x8x16x8xf32>
    tpu.vector_store %arg4[%c0_16, %c0_17, %c0_18, %c0_19, %c0_20], %47 {strides = array<i32>} : memref<1x2x8x16x8xf32, #tpu.memory_space<vmem>>, vector<1x1x8x16x8xf32>,
    %48 = vector.extract_strided_slice %42 {offsets = [0, 8], sizes = [128, 8], strides = [1, 1]} : vector<128x16xf32> to vector<128x8xf32>
    %49 = vector.shape_cast %48 : vector<128x8xf32> to vector<8x16x8xf32>
    %c0_21 = arith.constant 0 : index
    %c1 = arith.constant 1 : index
    %c0_22 = arith.constant 0 : index
    %c0_23 = arith.constant 0 : index
    %c0_24 = arith.constant 0 : index
    %50 = vector.load %arg4[%c0_21, %c1, %c0_22, %c0_23, %c0_24] : memref<1x2x8x16x8xf32, #tpu.memory_space<vmem>>, vector<1x1x8x16x8xf32>
    %51 = vector.shape_cast %50 : vector<1x1x8x16x8xf32> to vector<8x16x8xf32>
    %52 = vector.shape_cast %49 : vector<8x16x8xf32> to vector<1x1x8x16x8xf32>
    tpu.vector_store %arg4[%c0_21, %c1, %c0_22, %c0_23, %c0_24], %52 {strides = array<i32>} : memref<1x2x8x16x8xf32, #tpu.memory_space<vmem>>, vector<1x1x8x16x8xf32>,
    return
  }
  func.func @transform_0(%arg0: i32, %arg1: i32) -> (i32, i32, i32, i32) {
    %c0_i32 = arith.constant 0 : i32
    %c0_i32_0 = arith.constant 0 : i32
    %c0_i32_1 = arith.constant 0 : i32
    %c0_i32_2 = arith.constant 0 : i32
    return %arg0, %c0_i32, %c0_i32_0, %c0_i32_1 : i32, i32, i32, i32
  }
  func.func @transform_1(%arg0: i32, %arg1: i32) -> (i32, i32) {
    %c0_i32 = arith.constant 0 : i32
    %c0_i32_0 = arith.constant 0 : i32
    %c0_i32_1 = arith.constant 0 : i32
    return %c0_i32, %c0_i32_0 : i32, i32
  }
  func.func @transform_2(%arg0: i32, %arg1: i32) -> (i32, i32, i32, i32, i32) {
    %c0_i32 = arith.constant 0 : i32
    %c0_i32_0 = arith.constant 0 : i32
    %c0_i32_1 = arith.constant 0 : i32
    %c0_i32_2 = arith.constant 0 : i32
    return %arg0, %c0_i32, %arg1, %c0_i32_0, %c0_i32_1 : i32, i32, i32, i32, i32
  }
}

</mosaic_0001>

<bundles_post_ra>
// kernel: upsample.1
= control target key start
LH: loop header
LB: loop body
LE: loop exit
PB: predicated region body
PF: predicated region fallthrough
CT: control target
= control target key end

     0   :  { %s1402_s9 = smov 0   ;;  %s1404_s10 = smov 0   ;;  %s2037_s0 = inlined_call_operand.vmem [shape: f32[2,16,16,8], index: 0, kind: input, shape index: {}]   ;;  %s2038_s1 = inlined_call_operand.vmem [shape: bf16[72,16], index: 1, kind: input, shape index: {}]   ;;  %s2039_s2 = inlined_call_operand.vmem [shape: f32[2,2,16,16,8], index: 2, kind: output, shape index: {}]  }
   0x1   :  { %s1406_s11 = smov 0   ;;  %s1408_s12 = smov 0  }
   0x2   :  { %s1410_s13 = smov 0   ;;  %s1412_s14 = smov 0  }
   0x3   :  { %s1414_s15 = smov 0  }
   0x4 LB: > { %s21_s16 = sadd.s32 1, %s1368_s13  ;;  %s24_s17 = sadd.s32 1, %s1372_s14  ;;  %s1376_s15 = sphi %s1414_s15, %s12_s15   ;;  %s1372_s14 = sphi %s1412_s14, %s2050_s14   ;;  %s1368_s13 = sphi %s1410_s13, %s2049_s13   ;;  %s1364_s12 = sphi %s1408_s12, %s2048_s12   ;;  %s1360_s11 = sphi %s1406_s11, %s2047_s11   ;;  %s1356_s10 = sphi %s1404_s10, %s2046_s10   ;;  %s1352_s9 = sphi %s1402_s9, %s2045_s9  }
   0x5   : > { %p22_p0 = scmp.ge.s32.totalorder %s21_s16, 2  ;;  %s1137_s18 = sadd.s32 4294967295, %s1376_s15  }
   0x6   : > { %p90_p1 = scmp.ne.s32.totalorder %s1356_s10, %s1352_s9  ;;  %p91_p2 = scmp.eq.s32.totalorder %s1137_s18, 3 }
   0x7   : > { %s2052_s16 = smov (%p22_p0, %s21_s16), 0  ;;  %s2054_s17 = smov (!%p22_p0, %s24_s17), %s1372_s14 }
   0x8   : > { %s76_s19 = ssub.s32 %s1368_s13, %s2052_s16  ;;  %p26_p3 = scmp.ge.s32.totalorder %s2054_s17, 2 }
   0x9   : > { %p1141_p4 = scmp.ge.s32.totalorder %s1376_s15, 1  ;;  %p1448_p5 = por %p91_p2, %p90_p1 }
   0xa   : > { %p126_p6 = scmp.lt.s32.totalorder %s1376_s15, 5  ;;  %s2056_s17 = smov (%p26_p3, %s2054_s17), 0 }
   0xb   : > { %s75_s21 = ssub.s32 %s1372_s14, %s2056_s17  ;;  %s80_s23 = sadd.s32 1, %s1356_s10 }
   0xc   : > { %p127_p7 = pnand %p1141_p4, %p126_p6  ;;  %s77_s22 = sor.u32 %s76_s19, %s75_s21 }
   0xd   : > { %p78_p8 = scmp.eq.s32.totalorder %s77_s22, 0  ;;  %p147_p9 = scmp.lt.s32.totalorder (!%p127_p7), %s1364_s12, 1  ;;  %vm332_vm0 = vcmask (!%p127_p7), 1047552   ;;  %vm333_vm1 = vsmask.f32 (!%p127_p7), 7424  ;;  %vm289_vm3 = vcmask (!%p127_p7), 1040384  }
   0xe   : > { %130 = sbr.rel (%p127_p7) target bundleno = 621 (0x26d), region = 28  ;;  %s1187_s25 = sshll.u32 (!%p127_p7), %s1360_s11, 7  ;;  %vm1501_vm2 = vmand (!%p127_p7), %vm332_vm0, %vm333_vm1  ;;  %vm290_vm4 = vsmask.f32 (!%p127_p7), 256  ;;  %vm699_vm6 = vcmask (!%p127_p7), 1043456   ;;  %vm527_vm7 = vcmask (!%p127_p7), 130048  }
   0xf   : > { %s1459_s24 = scalar_select %p78_p8, %s1356_s10, %s80_s23  }
  0x10   : > { %s1145_s26 = sshll.u32 (!%p127_p7), %s1360_s11, 3  ;;  %p187_p12 = scmp.gt.s32.totalorder (!%p127_p7), %s1360_s11, 0  ;;  %vm1548_vm5 = vmand (!%p127_p7), %vm289_vm3, %vm290_vm4  ;;  %vm502_vm8 = vcmask (!%p127_p7), 64512   ;;  %vm544_vm9 = vcmask (!%p127_p7), 195584   ;;  %vm561_vm10 = vcmask (!%p127_p7), 261120   ;;  %vm578_vm11 = vcmask (!%p127_p7), 326656  }
  0x11   : > { %s1147_s28 = sadd.s32 (!%p127_p7), 4294967295, %s1145_s26  ;;  %s180_s29 = sadd.s32 (!%p127_p7), 8, %s1145_s26  ;;  %vm595_vm12 = vcmask (!%p127_p7), 392192   ;;  %vm612_vm13 = vcmask (!%p127_p7), 457728   ;;  %vm629_vm14 = vcmask (!%p127_p7), 523264   ;;  %vm682_vm15 = vcmask (!%p127_p7), 588800  }
  0x12   : > { %p174_p10 = scmp.gt.s32.totalorder (!%p127_p7), %s1147_s28, 0  ;;  %p181_p11 = scmp.lt.s32.totalorder (!%p127_p7), %s180_s29, 15 }
  0x13   : > { %s1378_s7 = smov (!%p127_p7), 8   ;;  %s1379_s23 = smov (!%p127_p7), 16  }
  0x14   : > { %p193_p13 = scmp.lt.s32.totalorder (!%p127_p7), %s1360_s11, 1  ;;  %s1380_s26 = smov (!%p127_p7), 24  }
  0x15   : > { %s148_s27 = scalar_select %p147_p9, %s1364_s12, 1 }
  0x16   : > { %s2058_s28 = smov (!%p174_p10, %s1147_s28), 0  ;;  %s2060_s29 = smov (!%p181_p11, %s180_s29), 15 }
  0x17   : > { %s1186_s30 = sshll.u32 %s148_s27, 8  ;;  %s1148_s8 = sshll.u32 %s2058_s28, 4 }
  0x18   : > { %s1468_s5 = scalar_lea.vmem %s2037_s0, %s1186_s30  ;;  %s1149_s19 = sshll.u32 %s2060_s29, 4 }
  0x19   : > { %s1471_s6 = scalar_lea.vmem %s1468_s5, %s1187_s25  ;;  %s177_s18 = scalar_lea.vmem %s1468_s5, %s1148_s8 }
  0x1a   : > { %v163_v0 = vld [vmem:[%s1471_s6 + $0x30] sm:$0xff]  ;;  %v164_v1 = vld [vmem:[%s1471_s6 + $0x38] sm:$0xff]  ;;  %v157_v2 = vld [vmem:[%s1471_s6] sm:$0xff]  ;;  %s1306_s21 = scalar_select %p187_p12, 255, 0 }
  0x1b   : > { %v1477_v3 = vpack.c.bf16 %v164_v1, %v163_v0  ;;  %v158_v4 = vld [vmem:[%s1471_s6 + $0x8] sm:$0xff]  ;;  %v165_v5 = vld [vmem:[%s1471_s6 + $0x40] sm:$0xff]  ;;  %v167_v9 = vld [vmem:[%s1471_s6 + $0x50] sm:$0xff]  ;;  %s1524_s22 = scalar_lea.vmem %s1468_s5, %s1149_s19  ;;  %s1381_s27 = smov 32  }
  0x1c   : > { %v166_v6 = vld [vmem:[%s1471_s6 + $0x48] sm:$0xff]  ;;  %v1482_v7 = vpack.c.bf16 %v158_v4, %v157_v2  ;;  %v168_v10 = vld [vmem:[%s1471_s6 + $0x58] sm:$0xff]  ;;  %v159_v23 = vld [vmem:[%s1471_s6 + $0x10] sm:$0xff]  ;;  %s1312_s25 = scalar_select %p193_p13, 255, 0 }
  0x1d   : > { %v1486_v8 = vpack.c.bf16 %v166_v6, %v165_v5  ;;  %361 = vrot.lane.b32.xlu0 %v1477_v3, %s1378_s7  ;;  %v238_v11 = vshrl.u32 %v1477_v3, 16  ;;  %v241_v12 = vshll.u32 %v1477_v3, 16  ;;  %v1499_v17 = vpack.c.bf16 %v168_v10, %v167_v9  ;;  %v160_v24 = vld [vmem:[%s1471_s6 + $0x18] sm:$0xff]  ;;  %v1307_v29 = vld [vmem:[%s177_s18] sm:%s1306_s21]  ;;  %s1382_s28 = smov 40   ;;  %s1383_s3 = smov 48  }
  0x1e   : > { %355 = vrot.lane.b32.xlu1 %v1482_v7, %s1378_s7  ;;  %v220_v13 = vshll.u32 %v1482_v7, 16  ;;  %v217_v21 = vshrl.u32 %v1482_v7, 16  ;;  %v1519_v30 = vpack.c.bf16 %v160_v24, %v159_v23  ;;  %v171_v31 = vld [vmem:[%s1471_s6 + $0x70] sm:$0xff]  ;;  %v172_v32 = vld [vmem:[%s1471_s6 + $0x78] sm:$0xff]  ;;  %s1385_s29 = smov 64  }
  0x1f   : > { %v248_v14 = vshll.u32 %v1486_v8, 16  ;;  %v310_v15 = vrot.slane %v241_v12, 1  ;;  %v245_v16 = vshrl.u32 %v1486_v8, 16  ;;  %v252_v28 = vshrl.u32 %v1499_v17, 16  ;;  %v1310_v33 = vld [vmem:[%s177_s18 + $0x8] sm:%s1306_s21]  ;;  %v1313_v63 = vld [vmem:[%s1524_s22] sm:%s1312_s25] }
  0x20   : > { %v304_v22 = vrot.slane %v220_v13, 1  ;;  %v219_v35 = vrot.slane %v217_v21, 7  ;;  %v199_v36 = vpack.c.bf16 %v1310_v33, %v1307_v29  ;;  %v255_v37 = vshll.u32 %v1499_v17, 16  ;;  %v1316_v4 = vld [vmem:[%s1524_s22 + $0x8] sm:%s1312_s25]  ;;  %s1384_s18 = smov 56  }
  0x21   : > { %v312_v19 = vrot.slane %v248_v14, 1  ;;  %v311_v20 = vor.u32 %v310_v15, %v238_v11  ;;  %v247_v27 = vrot.slane %v245_v16, 7  ;;  %v254_v40 = vrot.slane %v252_v28, 7  ;;  %v162_v33 = vld [vmem:[%s1471_s6 + $0x28] sm:$0xff] }
  0x22   : > { %363 = vrot.lane.b32.xlu1 %v1486_v8, %s1378_s7  ;;  %v305_v34 = vor.u32 %v304_v22, %v217_v21  ;;  %v1536_v41 = vpack.c.bf16 %v172_v32, %v171_v31  ;;  %353 = vrot.lane.b32.xlu0 %v199_v36, %s1378_s7  ;;  %v213_v42 = vshll.u32 %v199_v36, 16  ;;  %v224_v43 = vshrl.u32 %v1519_v30, 16  ;;  %v161_v32 = vld [vmem:[%s1471_s6 + $0x20] sm:$0xff] }
  0x23   : > { %v1516_v25 = vsel %vm1501_vm2, %v311_v20, 0  ;;  %v313_v26 = vor.u32 %v312_v19, %v245_v16  ;;  %v250_v39 = vor.u32 %v248_v14, %v247_v27  ;;  %v240_v44 = vrot.slane %v238_v11, 7  ;;  %v169_v16 = vld [vmem:[%s1471_s6 + $0x60] sm:$0xff]  ;;  %v170_v19 = vld [vmem:[%s1471_s6 + $0x68] sm:$0xff] }
  0x24   : > { %v1542_v45 = vsel %vm1501_vm2, %v305_v34, 0  ;;  %v222_v46 = vor.u32 %v220_v13, %v219_v35  ;;  %v210_v47 = vshrl.u32 %v199_v36, 16  ;;  %v302_v49 = vrot.slane %v213_v42, 1 }
  0x25   : > { %v1532_v38 = vsel %vm1501_vm2, %v313_v26, 0  ;;  %v1554_v50 = vsel %vm1548_vm5, 0, %v250_v39  ;;  %v257_v51 = vor.u32 %v255_v37, %v254_v40  ;;  %v266_v52 = vshrl.u32 %v1536_v41, 16 }
  0x26   : > { %385 = vrot.lane.b32.xlu1 %v1516_v25, %s1379_s23  ;;  %v269_v53 = vshll.u32 %v1536_v41, 16  ;;  %379 = vrot.lane.b32.xlu0 %v1542_v45, %s1379_s23  ;;  %v212_v54 = vrot.slane %v210_v47, 7  ;;  %v226_v55 = vrot.slane %v224_v43, 7  ;;  %v227_v56 = vshll.u32 %v1519_v30, 16 }
  0x27   : > { %v243_v57 = vor.u32 %v241_v12, %v240_v44  ;;  %v1567_v58 = vsel %vm1548_vm5, 0, %v222_v46  ;;  %v303_v59 = vor.u32 %v302_v49, %v210_v47  ;;  %v268_v60 = vrot.slane %v266_v52, 7  ;;  %v1317_v44 = vld [vmem:[%s2038_s1] sm:$0xff]  }
  0x28   : > { %v318_v61 = vrot.slane %v269_v53, 1  ;;  %v1578_v0 = vsel %vm1548_vm5, 0, %v257_v51  ;;  %v229_v5 = vor.u32 %v227_v56, %v226_v55  ;;  %v1583_v6 = vpack.c.bf16 %v1316_v4, %v1313_v63  ;;  %1202 = vmatprep.subr.bf16.mxu0 %v1317_v44  ;;  %1228 = vmatprep.subr.bf16.mxu1 %v1317_v44  ;;  %v1318_v51 = vld [vmem:[%s2038_s1 + $0x8] sm:$0xff]   ;;  %v1320_v55 = vld [vmem:[%s2038_s1 + $0x18] sm:$0xff]  }
  0x29   : > { %v1573_v62 = vsel %vm1548_vm5, 0, %v243_v57  ;;  %v271_v1 = vor.u32 %v269_v53, %v268_v60  ;;  %v1585_v9 = vor.u32 %v213_v42, %v212_v54  ;;  %v335_v10 = vsel %vm1501_vm2, %v303_v59, 0  ;;  %1203 = vmatpush3.bf16.msra.mxu0 %v1317_v44  ;;  %1233 = vmatpush3.bf16.msra.mxu1 %v1317_v44  ;;  %v1319_v53 = vld [vmem:[%s2038_s1 + $0x10] sm:$0xff]  }
  0x2a   : > { %387 = vrot.lane.b32.xlu1 %v1532_v38, %s1379_s23  ;;  %v319_v2 = vor.u32 %v318_v61, %v266_v52  ;;  %401 = vrot.lane.b32.xlu0 %v1567_v58, %s1380_s26  ;;  %v273_v13 = vshrl.u32 %v1583_v6, 16  ;;  %v276_v14 = vshll.u32 %v1583_v6, 16  ;;  %v1609_v22 = vsel %vm1548_vm5, 0, %v229_v5 }
  0x2b   : > { %v1591_v11 = vsel %vm1548_vm5, 0, %v271_v1  ;;  %v292_v15 = vsel %vm1548_vm5, 0, %v1585_v9  ;;  %v314_v26 = vrot.slane %v255_v37, 1  ;;  %v1617_v27 = vpack.c.bf16 %v170_v19, %v169_v16  ;;  %1204 = vmatprep.subr.bf16.mxu0 %v1318_v51  ;;  %1229 = vmatprep.subr.bf16.mxu1 %v1318_v51 }
  0x2c   : > { %v1595_v12 = vsel %vm1501_vm2, %v319_v2, 0  ;;  %v275_v20 = vrot.slane %v273_v13, 7  ;;  %v320_v21 = vrot.slane %v276_v14, 1  ;;  %v306_v36 = vrot.slane %v227_v56, 1  ;;  %v1321_v56 = vld [vmem:[%s2038_s1 + $0x20] ss:$0 sps:$4 sm:$0xff]  }
  0x2d   : > { %v315_v34 = vor.u32 %v314_v26, %v252_v28  ;;  %v259_v35 = vshrl.u32 %v1617_v27, 16  ;;  %v1636_v37 = vpack.c.bf16 %v162_v33, %v161_v32  ;;  %v262_v42 = vshll.u32 %v1617_v27, 16  ;;  %1205 = vmatpush3.bf16.msra.mxu0 %v1318_v51  ;;  %1234 = vmatpush3.bf16.msra.mxu1 %v1318_v51 }
  0x2e   : > { %409 = vrot.lane.b32.xlu1 %v1554_v50, %s1380_s26  ;;  %377 = vrot.lane.b32.xlu0 %v335_v10, %s1379_s23  ;;  %v1613_v23 = vor.u32 %v276_v14, %v275_v20  ;;  %v1615_v24 = vor.u32 %v320_v21, %v273_v13  ;;  %v701_v59 = vsel %vm699_vm6, %v1321_v56, 0 }
  0x2f   : > { %v1642_v39 = vsel %vm1501_vm2, %v315_v34, 0  ;;  %v261_v40 = vrot.slane %v259_v35, 7  ;;  %v231_v28 = vshrl.u32 %v1636_v37, 16  ;;  %1206 = vmatprep.subr.bf16.mxu0 %v1319_v53  ;;  %1230 = vmatprep.subr.bf16.mxu1 %v1319_v53  ;;  %v316_v57 = vrot.slane %v262_v42, 1 }
  0x30   : > { %v301_v29 = vsel %vm1548_vm5, 0, %v1613_v23  ;;  %v344_v31 = vsel %vm1501_vm2, %v1615_v24, 0 }
  0x31   : > { %v264_v46 = vor.u32 %v262_v42, %v261_v40  ;;  %v233_v49 = vrot.slane %v231_v28, 7  ;;  %1207 = vmatpush3.bf16.msra.mxu0 %v1319_v53  ;;  %1235 = vmatpush3.bf16.msra.mxu1 %v1319_v53  ;;  %v317_v60 = vor.u32 %v316_v57, %v259_v35 }
  0x32   : > { %411 = vrot.lane.b32.xlu1 %v1578_v0, %s1380_s26  ;;  %403 = vrot.lane.b32.xlu0 %v1609_v22, %s1380_s26 }
  0x33   : > { %1208 = vmatprep.subr.bf16.mxu0 %v1320_v55  ;;  %1231 = vmatprep.subr.bf16.mxu1 %v1320_v55  ;;  %v342_v63 = vsel %vm1501_vm2, %v317_v60, 0 }
  0x35   : > { %1209 = vmatpush3.bf16.msra.mxu0 %v1320_v55  ;;  %1236 = vmatpush3.bf16.msra.mxu1 %v1320_v55 }
  0x36   : > { %426 = vrot.lane.b32.xlu1 %v1486_v8, %s1381_s27  ;;  %418 = vrot.lane.b32.xlu0 %v1482_v7, %s1381_s27  ;;  %v307_v7 = vor.u32 %v306_v36, %v224_v43  ;;  %v234_v43 = vshll.u32 %v1636_v37, 16 }
  0x37   : > { %1238 = vmatprep.subr.msk.bf16.mxu0 %vm699_vm6, %v1321_v56  ;;  %1239 = vmatprep.subr.msk.bf16.mxu1 %vm699_vm6, %v1321_v56 }
  0x38   : > { %v337_v47 = vsel %vm1501_vm2, %v307_v7, 0  ;;  %v236_v52 = vor.u32 %v234_v43, %v233_v49  ;;  %v308_v61 = vrot.slane %v234_v43, 1 }
  0x39   : > { %1211 = vmatpush3.bf16.msra.mxu0 %v701_v59  ;;  %1237 = vmatpush3.bf16.msra.mxu1 %v701_v59 }
  0x3a   : > { %428 = vrot.lane.b32.xlu1 %v1499_v17, %s1381_s27  ;;  %420 = vrot.lane.b32.xlu0 %v1519_v30, %s1381_s27  ;;  %v1679_v54 = vsel %vm1548_vm5, 0, %v236_v52  ;;  %v309_v1 = vor.u32 %v308_v61, %v231_v28 }
  0x3c   : > { %v338_v2 = vsel %vm1501_vm2, %v309_v1, 0 }
  0x3e   : > { %443 = vrot.lane.b32.xlu1 %v1532_v38, %s1382_s28  ;;  %435 = vrot.lane.b32.xlu0 %v1542_v45, %s1382_s28  ;;  %v1667_v45 = vsel %vm1548_vm5, 0, %v264_v46 }
  0x42   : > { %445 = vrot.lane.b32.xlu1 %v1642_v39, %s1382_s28  ;;  %437 = vrot.lane.b32.xlu0 %v337_v47, %s1382_s28 }
  0x46   : > { %460 = vrot.lane.b32.xlu1 %v1578_v0, %s1383_s3  ;;  %452 = vrot.lane.b32.xlu0 %v1609_v22, %s1383_s3 }
  0x4a   : > { %462 = vrot.lane.b32.xlu1 %v1667_v45, %s1383_s3  ;;  %454 = vrot.lane.b32.xlu0 %v1679_v54, %s1383_s3 }
  0x4e   : > { %477 = vrot.lane.b32.xlu1 %v1499_v17, %s1384_s18  ;;  %469 = vrot.lane.b32.xlu0 %v1519_v30, %s1384_s18 }
  0x52   : > { %479 = vrot.lane.b32.xlu1 %v1617_v27, %s1384_s18  ;;  %471 = vrot.lane.b32.xlu0 %v1636_v37, %s1384_s18 }
  0x56   : > { %494 = vrot.lane.b32.xlu1 %v1642_v39, %s1385_s29  ;;  %486 = vrot.lane.b32.xlu0 %v337_v47, %s1385_s29 }
  0x5a   : > { %365 = vrot.lane.b32.xlu1 %v1499_v17, %s1378_s7  ;;  %357 = vrot.lane.b32.xlu0 %v1519_v30, %s1378_s7 }
  0x5e   : > { %496 = vrot.lane.b32.xlu1 %v342_v63, %s1385_s29  ;;  %488 = vrot.lane.b32.xlu0 %v338_v2, %s1385_s29 }
  0x62   : > { %367 = vrot.lane.b32.xlu1 %v1617_v27, %s1378_s7  ;;  %359 = vrot.lane.b32.xlu0 %v1636_v37, %s1378_s7  ;;  %s144_s7 = sand.u32 1, %s1352_s9   ;;  %s1188_s9 = sshll.u32 (%p1448_p5), %s1360_s11, 4 }
  0x66   : > { %389 = vrot.lane.b32.xlu1 %v1642_v39, %s1379_s23  ;;  %381 = vrot.lane.b32.xlu0 %v337_v47, %s1379_s23 }
  0x6a   : > { %391 = vrot.lane.b32.xlu1 %v342_v63, %s1379_s23  ;;  %383 = vrot.lane.b32.xlu0 %v338_v2, %s1379_s23  ;;  %s1142_s23 = sshll.u32 %s144_s7, 8 }
  0x6e   : > { %413 = vrot.lane.b32.xlu1 %v1667_v45, %s1380_s26  ;;  %405 = vrot.lane.b32.xlu0 %v1679_v54, %s1380_s26 }
  0x72   : > { %415 = vrot.lane.b32.xlu1 %v1591_v11, %s1380_s26  ;;  %407 = vrot.lane.b32.xlu0 %v1573_v62, %s1380_s26  ;;  %s1861_s26 = scalar_lea.vmem [#allocation2], %s1142_s23 }
  0x76   : > { %430 = vrot.lane.b32.xlu1 %v1617_v27, %s1381_s27  ;;  %422 = vrot.lane.b32.xlu0 %v1636_v37, %s1381_s27 }
  0x7a   : > { %432 = vrot.lane.b32.xlu1 %v1536_v41, %s1381_s27  ;;  %424 = vrot.lane.b32.xlu0 %v1477_v3, %s1381_s27  ;;  %s1386_s27 = smov 120  }
  0x7e   : > { %447 = vrot.lane.b32.xlu1 %v342_v63, %s1382_s28  ;;  %439 = vrot.lane.b32.xlu0 %v338_v2, %s1382_s28 }
  0x82   : > { %449 = vrot.lane.b32.xlu1 %v1595_v12, %s1382_s28  ;;  %441 = vrot.lane.b32.xlu0 %v1516_v25, %s1382_s28  ;;  %s1182_s28 = sshll.u32 (%p1448_p5), %s1364_s12, 6 }
  0x83   : > { %s907_s20 = sadd.s32 (%p1448_p5), %s1188_s9, %s1182_s28 }
  0x84   : > { %s1183_s30 = sshll.u32 (%p1448_p5), %s907_s20, 3 }
  0x85   : > { %s1959_s5 = scalar_lea.vmem (%p1448_p5), %s2039_s2, %s1183_s30 }
  0x86   : > { %464 = vrot.lane.b32.xlu1 %v1591_v11, %s1383_s3  ;;  %456 = vrot.lane.b32.xlu0 %v1573_v62, %s1383_s3 }
  0x8a   : > { %466 = vrot.lane.b32.xlu1 %v301_v29, %s1383_s3  ;;  %458 = vrot.lane.b32.xlu0 %v1554_v50, %s1383_s3 }
  0x8e   : > { %481 = vrot.lane.b32.xlu1 %v1536_v41, %s1384_s18  ;;  %473 = vrot.lane.b32.xlu0 %v1477_v3, %s1384_s18 }
  0x8f   : > { %v362_v30 = vpop.permute.xlu0 %361 }
  0x90   : > { %v1754_v17 = vpop.permute.xlu1 %355 }
  0x91   : > { %v508_v59 = vsel %vm502_vm8, %v1567_v58, %v1754_v17 }
  0x92   : > { %483 = vrot.lane.b32.xlu1 %v1583_v6, %s1384_s18  ;;  %475 = vrot.lane.b32.xlu0 %v1486_v8, %s1384_s18 }
  0x94   : > { %v364_v4 = vpop.permute.xlu1 %363  ;;  %v354_v5 = vpop.permute.xlu0 %353 }
  0x95   : > { %v505_v36 = vsel %vm502_vm8, %v292_v15, %v354_v5  ;;  %v520_v48 = vsel %vm502_vm8, %v1554_v50, %v364_v4 }
  0x96   : > { %498 = vrot.lane.b32.xlu1 %v1595_v12, %s1385_s29  ;;  %490 = vrot.lane.b32.xlu0 %v1516_v25, %s1385_s29 }
  0x98   : > { %v386_v41 = vpop.permute.xlu1 %385  ;;  %v1771_v6 = vpop.permute.xlu0 %379 }
  0x99   : > { %v531_v63 = vsel %vm527_vm7, %v508_v59, %v1771_v6 }
  0x9a   : > { %500 = vrot.lane.b32.xlu1 %v344_v31, %s1385_s29  ;;  %492 = vrot.lane.b32.xlu0 %v1532_v38, %s1385_s29  ;;  %v517_v38 = vsel %vm502_vm8, %v1573_v62, %v362_v30 }
  0x9b   : > { %v537_v32 = vsel %vm527_vm7, %v517_v38, %v386_v41 }
  0x9c   : > { %v388_v3 = vpop.permute.xlu1 %387  ;;  %v402_v11 = vpop.permute.xlu0 %401 }
  0x9d   : > { %v539_v44 = vsel %vm527_vm7, %v520_v48, %v388_v3 }
  0xa0   : > { %v410_v10 = vpop.permute.xlu1 %409  ;;  %v378_v12 = vpop.permute.xlu0 %377 }
  0xa1   : > { %v554_v33 = vsel %vm544_vm9, %v537_v32, %v410_v10  ;;  %v529_v39 = vsel %vm527_vm7, %v505_v36, %v378_v12 }
  0xa2   : > { %v546_v9 = vsel %vm544_vm9, %v529_v39, %v402_v11 }
  0xa4   : > { %v412_v8 = vpop.permute.xlu1 %411  ;;  %v404_v14 = vpop.permute.xlu0 %403 }
  0xa5   : > { %v556_v47 = vsel %vm544_vm9, %v539_v44, %v412_v8  ;;  %v548_v2 = vsel %vm544_vm9, %v531_v63, %v404_v14 }
  0xa8   : > { %v427_v13 = vpop.permute.xlu1 %426  ;;  %v419_v18 = vpop.permute.xlu0 %418 }
  0xa9   : > { %v571_v35 = vsel %vm561_vm10, %v554_v33, %v427_v13  ;;  %v563_v46 = vsel %vm561_vm10, %v546_v9, %v419_v18 }
  0xac   : > { %v429_v16 = vpop.permute.xlu1 %428  ;;  %v421_v20 = vpop.permute.xlu0 %420 }
  0xad   : > { %v573_v51 = vsel %vm561_vm10, %v556_v47, %v429_v16  ;;  %v565_v4 = vsel %vm561_vm10, %v548_v2, %v421_v20 }
  0xb0   : > { %v444_v19 = vpop.permute.xlu1 %443  ;;  %v436_v23 = vpop.permute.xlu0 %435 }
  0xb1   : > { %v588_v62 = vsel %vm578_vm11, %v571_v35, %v444_v19  ;;  %v580_v49 = vsel %vm578_vm11, %v563_v46, %v436_v23 }
  0xb4   : > { %v446_v21 = vpop.permute.xlu1 %445  ;;  %v438_v25 = vpop.permute.xlu0 %437 }
  0xb5   : > { %v590_v50 = vsel %vm578_vm11, %v573_v51, %v446_v21  ;;  %v582_v41 = vsel %vm578_vm11, %v565_v4, %v438_v25 }
  0xb8   : > { %v461_v24 = vpop.permute.xlu1 %460  ;;  %v453_v27 = vpop.permute.xlu0 %452 }
  0xb9   : > { %v605_v40 = vsel %vm595_vm12, %v588_v62, %v461_v24  ;;  %v597_v52 = vsel %vm595_vm12, %v580_v49, %v453_v27 }
  0xbc   : > { %v463_v26 = vpop.permute.xlu1 %462  ;;  %v455_v31 = vpop.permute.xlu0 %454 }
  0xbd   : > { %v607_v56 = vsel %vm595_vm12, %v590_v50, %v463_v26  ;;  %v599_v17 = vsel %vm595_vm12, %v582_v41, %v455_v31 }
  0xc0   : > { %v478_v29 = vpop.permute.xlu1 %477  ;;  %v470_v37 = vpop.permute.xlu0 %469 }
  0xc1   : > { %v622_v42 = vsel %vm612_vm13, %v605_v40, %v478_v29  ;;  %v614_v53 = vsel %vm612_vm13, %v597_v52, %v470_v37 }
  0xc4   : > { %v480_v34 = vpop.permute.xlu1 %479  ;;  %v472_v15 = vpop.permute.xlu0 %471 }
  0xc5   : > { %v624_v60 = vsel %vm612_vm13, %v607_v56, %v480_v34  ;;  %v616_v5 = vsel %vm612_vm13, %v599_v17, %v472_v15 }
  0xc8   : > { %v495_v7 = vpop.permute.xlu1 %494  ;;  %v487_v55 = vpop.permute.xlu0 %486 }
  0xc9   : > { %v639_v28 = vsel %vm629_vm14, %v622_v42, %v495_v7  ;;  %v631_v57 = vsel %vm629_vm14, %v614_v53, %v487_v55 }
  0xca   : > { %1220 = vmatprep.mubr.msk.bf16.mxu1 %vm682_vm15, %v639_v28  ;;  %1212 = vmatprep.mubr.msk.bf16.mxu0 %vm682_vm15, %v631_v57 }
  0xcc   : > { %v366_v43 = vpop.permute.xlu1 %365  ;;  %v358_v30 = vpop.permute.xlu0 %357 }
  0xcd   : > { %v523_v34 = vsel %vm502_vm8, %v1578_v0, %v366_v43  ;;  %v511_v0 = vsel %vm502_vm8, %v1609_v22, %v358_v30 }
  0xd0   : > { %v497_v61 = vpop.permute.xlu1 %496  ;;  %v489_v3 = vpop.permute.xlu0 %488 }
  0xd1   : > { %v641_v1 = vsel %vm629_vm14, %v624_v60, %v497_v61  ;;  %v633_v10 = vsel %vm629_vm14, %v616_v5, %v489_v3 }
  0xd2   : > { %1221 = vmatmul.mubr.msk.bf16.vlgmr.msra.gmra.mrb[0].mxu1 %vm682_vm15, %v641_v1  ;;  %1213 = vmatmul.mubr.msk.bf16.vlgmr.msra.gmra.mrb[0].mxu0 %vm682_vm15, %v633_v10 }
  0xd4   : > { %v368_v58 = vpop.permute.xlu1 %367  ;;  %v360_v11 = vpop.permute.xlu0 %359 }
  0xd5   : > { %v526_v40 = vsel %vm502_vm8, %v1667_v45, %v368_v58  ;;  %v514_v50 = vsel %vm502_vm8, %v1679_v54, %v360_v11 }
  0xd8   : > { %v390_v6 = vpop.permute.xlu1 %389  ;;  %v382_v12 = vpop.permute.xlu0 %381 }
  0xd9   : > { %v541_v36 = vsel %vm527_vm7, %v523_v34, %v390_v6  ;;  %v533_v46 = vsel %vm527_vm7, %v511_v0, %v382_v12 }
  0xdc   : > { %v392_v8 = vpop.permute.xlu1 %391  ;;  %v384_v14 = vpop.permute.xlu0 %383 }
  0xdd   : > { %v543_v28 = vsel %vm527_vm7, %v526_v40, %v392_v8  ;;  %v535_v57 = vsel %vm527_vm7, %v514_v50, %v384_v14 }
  0xe0   : > { %v414_v13 = vpop.permute.xlu1 %413  ;;  %v406_v18 = vpop.permute.xlu0 %405 }
  0xe1   : > { %v558_v62 = vsel %vm544_vm9, %v541_v36, %v414_v13  ;;  %v550_v49 = vsel %vm544_vm9, %v533_v46, %v406_v18 }
  0xe4   : > { %v416_v16 = vpop.permute.xlu1 %415  ;;  %v408_v20 = vpop.permute.xlu0 %407 }
  0xe5   : > { %v560_v9 = vsel %vm544_vm9, %v543_v28, %v416_v16  ;;  %v552_v61 = vsel %vm544_vm9, %v535_v57, %v408_v20 }
  0xe8   : > { %v431_v19 = vpop.permute.xlu1 %430  ;;  %v423_v23 = vpop.permute.xlu0 %422 }
  0xe9   : > { %v575_v39 = vsel %vm561_vm10, %v558_v62, %v431_v19  ;;  %v567_v22 = vsel %vm561_vm10, %v550_v49, %v423_v23 }
  0xec   : > { %v433_v21 = vpop.permute.xlu1 %432  ;;  %v425_v25 = vpop.permute.xlu0 %424 }
  0xed   : > { %v577_v47 = vsel %vm561_vm10, %v560_v9, %v433_v21  ;;  %v569_v54 = vsel %vm561_vm10, %v552_v61, %v425_v25 }
  0xf0   : > { %v448_v24 = vpop.permute.xlu1 %447  ;;  %v440_v27 = vpop.permute.xlu0 %439 }
  0xf1   : > { %v592_v42 = vsel %vm578_vm11, %v575_v39, %v448_v24  ;;  %v584_v53 = vsel %vm578_vm11, %v567_v22, %v440_v27 }
  0xf4   : > { %v450_v26 = vpop.permute.xlu1 %449  ;;  %v442_v38 = vpop.permute.xlu0 %441 }
  0xf5   : > { %v594_v43 = vsel %vm578_vm11, %v577_v47, %v450_v26  ;;  %v586_v30 = vsel %vm578_vm11, %v569_v54, %v442_v38 }
  0xf8   : > { %v465_v29 = vpop.permute.xlu1 %464  ;;  %v457_v32 = vpop.permute.xlu0 %456 }
  0xf9   : > { %v609_v48 = vsel %vm595_vm12, %v592_v42, %v465_v29  ;;  %v601_v59 = vsel %vm595_vm12, %v584_v53, %v457_v32 }
  0xfc   : > { %v467_v31 = vpop.permute.xlu1 %466  ;;  %v459_v35 = vpop.permute.xlu0 %458 }
  0xfd   : > { %v611_v52 = vsel %vm595_vm12, %v594_v43, %v467_v31  ;;  %v603_v4 = vsel %vm595_vm12, %v586_v30, %v459_v35 }
 0x100   : > { %v482_v33 = vpop.permute.xlu1 %481  ;;  %v474_v7 = vpop.permute.xlu0 %473 }
 0x101   : > { %v626_v15 = vsel %vm612_vm13, %v609_v48, %v482_v33  ;;  %v618_v63 = vsel %vm612_vm13, %v601_v59, %v474_v7 }
 0x104   : > { %v484_v37 = vpop.permute.xlu1 %483  ;;  %v476_v51 = vpop.permute.xlu0 %475 }
 0x105   : > { %v628_v55 = vsel %vm612_vm13, %v611_v52, %v484_v37  ;;  %v620_v41 = vsel %vm612_vm13, %v603_v4, %v476_v51 }
 0x108   : > { %v499_v44 = vpop.permute.xlu1 %498  ;;  %v491_v1 = vpop.permute.xlu0 %490 }
 0x109   : > { %v643_v45 = vsel %vm629_vm14, %v626_v15, %v499_v44  ;;  %v635_v2 = vsel %vm629_vm14, %v618_v63, %v491_v1 }
 0x10a   : > { %1224 = vmatprep.mubr.msk.bf16.mxu1 %vm682_vm15, %v643_v45  ;;  %1216 = vmatprep.mubr.msk.bf16.mxu0 %vm682_vm15, %v635_v2 }
 0x10c   : > { %v501_v56 = vpop.permute.xlu1 %500  ;;  %v493_v58 = vpop.permute.xlu0 %492 }
 0x10d   : > { %v645_v60 = vsel %vm629_vm14, %v628_v55, %v501_v56  ;;  %v637_v17 = vsel %vm629_vm14, %v620_v41, %v493_v58 }
 0x10e   : > { %1225 = vmatmul.mubr.msk.bf16.gmra.mrb[4].mxu1 %vm682_vm15, %v645_v60  ;;  %1217 = vmatmul.mubr.msk.bf16.gmra.mrb[4].mxu0 %vm682_vm15, %v637_v17 }
 0x1a5   : > { %v1222_v5 = vpop.f32.mrb[0].mxu1  ;;  %v1214_v11 = vpop.f32.mrb[0].mxu0 }
 0x1a6   : > { %810 = vst.msk [vmem:[%s1861_s26 + $0x50] sm:$0xff] %vm502_vm8, %v1222_v5  ;;  %v769_v3 = vpop.f32.mrb[1].mxu1  ;;  %852 = vrot.lane.b32.xlu0 %v1222_v5, %s1386_s27  ;;  %802 = vst.msk [vmem:[%s1861_s26 + $0x10] sm:$0xff] %vm502_vm8, %v1214_v11  ;;  %v737_v8 = vpop.f32.mrb[1].mxu0 }
 0x1a7   : > { %808 = vst.msk [vmem:[%s1861_s26 + $0x40] sm:$0xff] %vm502_vm8, %v769_v3  ;;  %v1223_v10 = vpop.f32.mrb[2].mxu1  ;;  %800 = vst.msk [vmem:[%s1861_s26] sm:$0xff] %vm502_vm8, %v737_v8  ;;  %v1215_v12 = vpop.f32.mrb[2].mxu0 }
 0x1a8   : > { %811 = vst.msk [vmem:[%s1861_s26 + $0x58] sm:$0xff] %vm502_vm8, %v1223_v10  ;;  %854 = vrot.lane.b32.xlu1 %v1223_v10, %s1386_s27  ;;  %v772_v6 = vpop.f32.mrb[3].mxu1  ;;  %803 = vst.msk [vmem:[%s1861_s26 + $0x18] sm:$0xff] %vm502_vm8, %v1215_v12  ;;  %v740_v13 = vpop.f32.mrb[3].mxu0 }
 0x1a9   : > { %809 = vst.msk [vmem:[%s1861_s26 + $0x48] sm:$0xff] %vm502_vm8, %v772_v6  ;;  %801 = vst.msk [vmem:[%s1861_s26 + $0x8] sm:$0xff] %vm502_vm8, %v740_v13 }
 0x1aa   : > { %848 = vrot.lane.b32.xlu0 %v769_v3, %s1386_s27 }
 0x1ac   : > { %850 = vrot.lane.b32.xlu1 %v772_v6, %s1386_s27 }
 0x1ad   : > { %v1003_v48 = vld [vmem:[%s1861_s26 + $0x10] sm:$0xff] (%p1448_p5) }
 0x1ae   : > { %836 = vrot.lane.b32.xlu0 %v1214_v11, %s1386_s27  ;;  %v999_v7 = vld [vmem:[%s1861_s26] sm:$0xff] (%p1448_p5)  ;;  %v1019_v49 = vld [vmem:[%s1861_s26 + $0x50] sm:$0xff] (%p1448_p5)  ;;  %1004 = vst [vmem:[%s1959_s5 + $0x10] sm:$0xff] (%p1448_p5), %v1003_v48 }
 0x1af   : > { %v1005_v0 = vld [vmem:[%s1861_s26 + $0x18] sm:$0xff] (%p1448_p5)  ;;  %v1015_v47 = vld [vmem:[%s1861_s26 + $0x40] sm:$0xff] (%p1448_p5)  ;;  %1000 = vst [vmem:[%s1959_s5] sm:$0xff] (%p1448_p5), %v999_v7  ;;  %1020 = vst [vmem:[%s1959_s5 + $0x50] sm:$0xff] (%p1448_p5), %v1019_v49 }
 0x1b0   : > { %838 = vrot.lane.b32.xlu1 %v1215_v12, %s1386_s27  ;;  %v1001_v28 = vld [vmem:[%s1861_s26 + $0x8] sm:$0xff] (%p1448_p5)  ;;  %v1021_v43 = vld [vmem:[%s1861_s26 + $0x58] sm:$0xff] (%p1448_p5)  ;;  %1006 = vst [vmem:[%s1959_s5 + $0x18] sm:$0xff] (%p1448_p5), %v1005_v0 }
 0x1b1   : > { %v1017_v45 = vld [vmem:[%s1861_s26 + $0x48] sm:$0xff] (%p1448_p5)  ;;  %1002 = vst [vmem:[%s1959_s5 + $0x8] sm:$0xff] (%p1448_p5), %v1001_v28  ;;  %1016 = vst [vmem:[%s1959_s5 + $0x40] sm:$0xff] (%p1448_p5), %v1015_v47 }
 0x1b2   : > { %832 = vrot.lane.b32.xlu0 %v737_v8, %s1386_s27  ;;  %1018 = vst [vmem:[%s1959_s5 + $0x48] sm:$0xff] (%p1448_p5), %v1017_v45  ;;  %1022 = vst [vmem:[%s1959_s5 + $0x58] sm:$0xff] (%p1448_p5), %v1021_v43 }
 0x1b4   : > { %834 = vrot.lane.b32.xlu1 %v740_v13, %s1386_s27 }
 0x1e1   : > { %v1226_v14 = vpop.f32.mrb[4].mxu1  ;;  %v1218_v20 = vpop.f32.mrb[4].mxu0 }
 0x1e2   : > { %814 = vst.msk [vmem:[%s1861_s26 + $0x70] sm:$0xff] %vm502_vm8, %v1226_v14  ;;  %v785_v16 = vpop.f32.mrb[5].mxu1  ;;  %806 = vst.msk [vmem:[%s1861_s26 + $0x30] sm:$0xff] %vm502_vm8, %v1218_v20  ;;  %v753_v21 = vpop.f32.mrb[5].mxu0 }
 0x1e3   : > { %812 = vst.msk [vmem:[%s1861_s26 + $0x60] sm:$0xff] %vm502_vm8, %v785_v16  ;;  %v1227_v18 = vpop.f32.mrb[6].mxu1  ;;  %856 = vrot.lane.b32.xlu0 %v785_v16, %s1386_s27  ;;  %804 = vst.msk [vmem:[%s1861_s26 + $0x20] sm:$0xff] %vm502_vm8, %v753_v21  ;;  %v1219_v23 = vpop.f32.mrb[6].mxu0 }
 0x1e4   : > { %815 = vst.msk [vmem:[%s1861_s26 + $0x78] sm:$0xff] %vm502_vm8, %v1227_v18  ;;  %v788_v19 = vpop.f32.mrb[7].mxu1  ;;  %807 = vst.msk [vmem:[%s1861_s26 + $0x38] sm:$0xff] %vm502_vm8, %v1219_v23  ;;  %v756_v24 = vpop.f32.mrb[7].mxu0 }
 0x1e5   : > { %813 = vst.msk [vmem:[%s1861_s26 + $0x68] sm:$0xff] %vm502_vm8, %v788_v19  ;;  %858 = vrot.lane.b32.xlu1 %v788_v19, %s1386_s27  ;;  %805 = vst.msk [vmem:[%s1861_s26 + $0x28] sm:$0xff] %vm502_vm8, %v756_v24 }
 0x1e7   : > { %844 = vrot.lane.b32.xlu0 %v1218_v20, %s1386_s27 }
 0x1e9   : > { %846 = vrot.lane.b32.xlu1 %v1219_v23, %s1386_s27  ;;  %v1011_v44 = vld [vmem:[%s1861_s26 + $0x30] sm:$0xff] (%p1448_p5) }
 0x1ea   : > { %v1007_v9 = vld [vmem:[%s1861_s26 + $0x20] sm:$0xff] (%p1448_p5)  ;;  %1012 = vst [vmem:[%s1959_s5 + $0x30] sm:$0xff] (%p1448_p5), %v1011_v44  ;;  %v1027_v52 = vld [vmem:[%s1861_s26 + $0x70] sm:$0xff] (%p1448_p5) }
 0x1eb   : > { %840 = vrot.lane.b32.xlu0 %v753_v21, %s1386_s27  ;;  %v1013_v46 = vld [vmem:[%s1861_s26 + $0x38] sm:$0xff] (%p1448_p5)  ;;  %1008 = vst [vmem:[%s1959_s5 + $0x20] sm:$0xff] (%p1448_p5), %v1007_v9  ;;  %v1023_v51 = vld [vmem:[%s1861_s26 + $0x60] sm:$0xff] (%p1448_p5) }
 0x1ec   : > { %v1009_v15 = vld [vmem:[%s1861_s26 + $0x28] sm:$0xff] (%p1448_p5)  ;;  %1014 = vst [vmem:[%s1959_s5 + $0x38] sm:$0xff] (%p1448_p5), %v1013_v46  ;;  %1024 = vst [vmem:[%s1959_s5 + $0x60] sm:$0xff] (%p1448_p5), %v1023_v51  ;;  %v1029_v50 = vld [vmem:[%s1861_s26 + $0x78] sm:$0xff] (%p1448_p5) }
 0x1ed   : > { %842 = vrot.lane.b32.xlu1 %v756_v24, %s1386_s27  ;;  %1010 = vst [vmem:[%s1959_s5 + $0x28] sm:$0xff] (%p1448_p5), %v1009_v15  ;;  %v1025_v22 = vld [vmem:[%s1861_s26 + $0x68] sm:$0xff] (%p1448_p5)  ;;  %1028 = vst [vmem:[%s1959_s5 + $0x70] sm:$0xff] (%p1448_p5), %v1027_v52 }
 0x1ee   : > { %1026 = vst [vmem:[%s1959_s5 + $0x68] sm:$0xff] (%p1448_p5), %v1025_v22  ;;  %1030 = vst [vmem:[%s1959_s5 + $0x78] sm:$0xff] (%p1448_p5), %v1029_v50 }
 0x1ef   : > { %860 = vrot.lane.b32.xlu0 %v1226_v14, %s1386_s27 }
 0x1f1   : > { %862 = vrot.lane.b32.xlu1 %v1227_v18, %s1386_s27 }
 0x218   : > { %v853_v25 = vpop.permute.xlu0 %852 }
 0x219   : > { %1173 = vst.msk [vmem:[%s1861_s26 + $0xd0] sm:$0xff] %vm502_vm8, %v853_v25 }
 0x21a   : > { %v855_v26 = vpop.permute.xlu1 %854 }
 0x21b   : > { %1174 = vst.msk [vmem:[%s1861_s26 + $0xd8] sm:$0xff] %vm502_vm8, %v855_v26 }
 0x21c   : > { %v849_v27 = vpop.permute.xlu0 %848 }
 0x21d   : > { %1171 = vst.msk [vmem:[%s1861_s26 + $0xc0] sm:$0xff] %vm502_vm8, %v849_v27 }
 0x21e   : > { %v851_v29 = vpop.permute.xlu1 %850 }
 0x21f   : > { %1172 = vst.msk [vmem:[%s1861_s26 + $0xc8] sm:$0xff] %vm502_vm8, %v851_v29 }
 0x220   : > { %v837_v38 = vpop.permute.xlu0 %836  ;;  %v1051_v2 = vld [vmem:[%s1861_s26 + $0xd0] sm:$0xff] (%p1448_p5) }
 0x221   : > { %1165 = vst.msk [vmem:[%s1861_s26 + $0x90] sm:$0xff] %vm502_vm8, %v837_v38  ;;  %1052 = vst [vmem:[%s1959_s5 + $0x150] sm:$0xff] (%p1448_p5), %v1051_v2 }
 0x222   : > { %v839_v31 = vpop.permute.xlu1 %838  ;;  %v1053_v30 = vld [vmem:[%s1861_s26 + $0xd8] sm:$0xff] (%p1448_p5) }
 0x223   : > { %1166 = vst.msk [vmem:[%s1861_s26 + $0x98] sm:$0xff] %vm502_vm8, %v839_v31  ;;  %1054 = vst [vmem:[%s1959_s5 + $0x158] sm:$0xff] (%p1448_p5), %v1053_v30 }
 0x224   : > { %v833_v32 = vpop.permute.xlu0 %832  ;;  %v1047_v1 = vld [vmem:[%s1861_s26 + $0xc0] sm:$0xff] (%p1448_p5) }
 0x225   : > { %1163 = vst.msk [vmem:[%s1861_s26 + $0x80] sm:$0xff] %vm502_vm8, %v833_v32  ;;  %1048 = vst [vmem:[%s1959_s5 + $0x140] sm:$0xff] (%p1448_p5), %v1047_v1 }
 0x226   : > { %v835_v33 = vpop.permute.xlu1 %834  ;;  %v1049_v54 = vld [vmem:[%s1861_s26 + $0xc8] sm:$0xff] (%p1448_p5) }
 0x227   : > { %1164 = vst.msk [vmem:[%s1861_s26 + $0x88] sm:$0xff] %vm502_vm8, %v835_v33  ;;  %1050 = vst [vmem:[%s1959_s5 + $0x148] sm:$0xff] (%p1448_p5), %v1049_v54 }
 0x228   : > { %v1035_v56 = vld [vmem:[%s1861_s26 + $0x90] sm:$0xff] (%p1448_p5) }
 0x229   : > { %1036 = vst [vmem:[%s1959_s5 + $0x110] sm:$0xff] (%p1448_p5), %v1035_v56 }
 0x22a   : > { %v1037_v57 = vld [vmem:[%s1861_s26 + $0x98] sm:$0xff] (%p1448_p5) }
 0x22b   : > { %1038 = vst [vmem:[%s1959_s5 + $0x118] sm:$0xff] (%p1448_p5), %v1037_v57 }
 0x22c   : > { %v1031_v53 = vld [vmem:[%s1861_s26 + $0x80] sm:$0xff] (%p1448_p5) }
 0x22d   : > { %1032 = vst [vmem:[%s1959_s5 + $0x100] sm:$0xff] (%p1448_p5), %v1031_v53 }
 0x22e   : > { %v1033_v55 = vld [vmem:[%s1861_s26 + $0x88] sm:$0xff] (%p1448_p5) }
 0x22f   : > { %1034 = vst [vmem:[%s1959_s5 + $0x108] sm:$0xff] (%p1448_p5), %v1033_v55 }
 0x255   : > { %v857_v34 = vpop.permute.xlu0 %856 }
 0x256   : > { %1175 = vst.msk [vmem:[%s1861_s26 + $0xe0] sm:$0xff] %vm502_vm8, %v857_v34 }
 0x257   : > { %v859_v35 = vpop.permute.xlu1 %858 }
 0x258   : > { %1176 = vst.msk [vmem:[%s1861_s26 + $0xe8] sm:$0xff] %vm502_vm8, %v859_v35 }
 0x259   : > { %v845_v36 = vpop.permute.xlu0 %844 }
 0x25a   : > { %1169 = vst.msk [vmem:[%s1861_s26 + $0xb0] sm:$0xff] %vm502_vm8, %v845_v36 }
 0x25b   : > { %v847_v62 = vpop.permute.xlu1 %846 }
 0x25c   : > { %1170 = vst.msk [vmem:[%s1861_s26 + $0xb8] sm:$0xff] %vm502_vm8, %v847_v62 }
 0x25d   : > { %v841_v37 = vpop.permute.xlu0 %840  ;;  %v1055_v4 = vld [vmem:[%s1861_s26 + $0xe0] sm:$0xff] (%p1448_p5) }
 0x25e   : > { %1167 = vst.msk [vmem:[%s1861_s26 + $0xa0] sm:$0xff] %vm502_vm8, %v841_v37  ;;  %903 = sbr.rel (!%p1448_p5) target bundleno = 621 (0x26d), region = 32  ;;  %1056 = vst [vmem:[%s1959_s5 + $0x160] sm:$0xff] (%p1448_p5), %v1055_v4 }
 0x25f   : > { %v843_v39 = vpop.permute.xlu1 %842  ;;  %v1057_v41 = vld [vmem:[%s1861_s26 + $0xe8] sm:$0xff] (%p1448_p5) }
 0x260   : > { %1168 = vst.msk [vmem:[%s1861_s26 + $0xa8] sm:$0xff] %vm502_vm8, %v843_v39  ;;  %1058 = vst [vmem:[%s1959_s5 + $0x168] sm:$0xff] (%p1448_p5), %v1057_v41 }
 0x261   : > { %v861_v40 = vpop.permute.xlu0 %860  ;;  %v1043_v61 = vld [vmem:[%s1861_s26 + $0xb0] sm:$0xff] (%p1448_p5) }
 0x262   : > { %1177 = vst.msk [vmem:[%s1861_s26 + $0xf0] sm:$0xff] %vm502_vm8, %v861_v40  ;;  %1044 = vst [vmem:[%s1959_s5 + $0x130] sm:$0xff] (%p1448_p5), %v1043_v61 }
 0x263   : > { %v863_v42 = vpop.permute.xlu1 %862  ;;  %v1045_v63 = vld [vmem:[%s1861_s26 + $0xb8] sm:$0xff] (%p1448_p5) }
 0x264   : > { %1178 = vst.msk [vmem:[%s1861_s26 + $0xf8] sm:$0xff] %vm502_vm8, %v863_v42  ;;  %1046 = vst [vmem:[%s1959_s5 + $0x138] sm:$0xff] (%p1448_p5), %v1045_v63 }
 0x265   : > { %v1039_v59 = vld [vmem:[%s1861_s26 + $0xa0] sm:$0xff] }
 0x266   : > { %1040 = vst [vmem:[%s1959_s5 + $0x120] sm:$0xff] %v1039_v59 }
 0x267   : > { %v1041_v60 = vld [vmem:[%s1861_s26 + $0xa8] sm:$0xff] }
 0x268   : > { %1042 = vst [vmem:[%s1959_s5 + $0x128] sm:$0xff] %v1041_v60 }
 0x269   : > { %v1059_v58 = vld [vmem:[%s1861_s26 + $0xf0] sm:$0xff] }
 0x26a   : > { %1060 = vst [vmem:[%s1959_s5 + $0x170] sm:$0xff] %v1059_v58 }
 0x26b   : > { %v1061_v17 = vld [vmem:[%s1861_s26 + $0xf8] sm:$0xff] }
 0x26c   : > { %1062 = vst [vmem:[%s1959_s5 + $0x178] sm:$0xff] %v1061_v17 }
 0x26d PF: > { %s12_s15 = sadd.s32 1, %s1376_s15   ;;  %s2045_s9 = smov %s1356_s10 }
 0x26e   : > { %p9_p0 = scmp.ge.s32.totalorder %s12_s15, 6   ;;  %s2046_s10 = smov %s1459_s24 }
 0x26f   : > { %s2047_s11 = smov %s1368_s13  ;;  %s2048_s12 = smov %s1372_s14 }
 0x270   : > { %s2049_s13 = smov %s2052_s16  ;;  %s2050_s14 = smov %s2056_s17 }
 0x271   :  { %11 = sbr.rel (!%p9_p0) target bundleno = 4 (0x4), region = 100 }

</bundles_post_ra>
